<compile_context>
chip_gen: v7x
topology: tpu7x:2x2x1
jax: 0.10.0
libtpu: 0.0.40
codegen_flags: <defaults>
</compile_context>

<pallas_src>
from functools import partial

import numpy as np
import jax
import jax.numpy as jnp
from jax.experimental import pallas as pl
from jax.experimental.pallas import tpu as pltpu

_LANE = 128          # lane width: last dim of every tile
_MAX_ROWS = 1024     # cap on sublane rows per tile (1024*128*4B = 512 KiB/buffer max)


def _pick_rows(num_rows: int) -> int:
    """Largest multiple of 8 that divides num_rows (capped); else the full extent."""
    cap = min(num_rows, _MAX_ROWS)
    for rows in range(cap, 0, -1):
        if rows % 8 == 0 and num_rows % rows == 0:
            return rows
    return num_rows  # < 8 rows or no aligned divisor: full extent is always legal


def _drop_path_kernel(factor_ref, x_ref, o_ref):
    # factor_ref: (B,) f32 in SMEM (scalar prefetch); x_ref/o_ref: (1, rows, 128) tiles.
    scale = factor_ref[pl.program_id(0)]                      # per-sample keep/(1-p)
    o_ref[...] = (x_ref[...].astype(jnp.float32) * scale).astype(o_ref.dtype)


def _drop_path_pallas(x, factor):
    """x: (B, ...) any float dtype.  factor: (B,) f32 = keep_mask / (1 - p)."""
    batch = x.shape[0]
    feat = int(np.prod(x.shape[1:]))
    x2 = x.reshape(batch, feat)

    feat_padded = ((feat + _LANE - 1) // _LANE) * _LANE
    if feat_padded != feat:
        # TODO(synk): ragged feature counts hit this pad/slice round-trip; production
        # MedFormer shapes are multiples of 128 and take the copy-free path below.
        x2 = jnp.pad(x2, ((0, 0), (0, feat_padded - feat)))

    num_rows = feat_padded // _LANE
    rows = _pick_rows(num_rows)
    x3 = x2.reshape(batch, num_rows, _LANE)
    grid = (batch, num_rows // rows)

    out = pl.pallas_call(
        _drop_path_kernel,
        out_shape=jax.ShapeDtypeStruct((batch, num_rows, _LANE), x.dtype),
        grid_spec=pltpu.PrefetchScalarGridSpec(
            num_scalar_prefetch=1,
            grid=grid,
            in_specs=[pl.BlockSpec((1, rows, _LANE), lambda b, r, fac: (b, r, 0))],
            out_specs=pl.BlockSpec((1, rows, _LANE), lambda b, r, fac: (b, r, 0)),
        ),
        compiler_params=pltpu.CompilerParams(
            dimension_semantics=("parallel", "parallel")),
    )(factor, x3)

    out = out.reshape(batch, feat_padded)
    if feat_padded != feat:
        out = out[:, :feat]
    return out.reshape(x.shape)


def drop_path(x, p, *, key=None, training=False):
    """Pallas DropPath matching the PyTorch forward.

    Identity when p == 0 or not training; otherwise each sample is kept with
    probability (1 - p) and rescaled by 1/(1 - p).
    """
    if (not p) or (not training):
        return x
    batch = x.shape[0]
    rand = jax.random.uniform(key, (batch,), jnp.float32)
    # torch: binary_mask = p < random_tensor;  x = x / (1 - p) * binary_mask
    factor = jnp.where(rand > p, 1.0 / (1.0 - p), 0.0).astype(jnp.float32)
    return _drop_path_pallas(x, factor)


def _reference(x, p, key):
    batch = x.shape[0]
    rand = jax.random.uniform(key, (batch,), jnp.float32)
    factor = jnp.where(rand > p, 1.0 / (1.0 - p), 0.0).astype(jnp.float32)
    bshape = (batch,) + (1,) * (x.ndim - 1)
    return (x.astype(jnp.float32) * factor.reshape(bshape)).astype(x.dtype)


if __name__ == "__main__":
    root = jax.random.PRNGKey(0)
    k_x1, k_x2, k_x3, k_d1, k_d2, k_d3 = jax.random.split(root, 6)
    p = 0.25

    dp_train = jax.jit(partial(drop_path, p=p, training=True))

    # 1) f32, NCDHW (B, C, D, H, W) = (2, 4, 8, 16, 16); F = 8192 (128-aligned hot path)
    x1 = jax.random.normal(k_x1, (2, 4, 8, 16, 16), jnp.float32)
    o1 = dp_train(x1, key=k_d1)
    jax.block_until_ready(o1)
    assert o1.shape == x1.shape and o1.dtype == x1.dtype
    np.testing.assert_allclose(np.asarray(o1), np.asarray(_reference(x1, p, k_d1)),
                               rtol=1e-6, atol=1e-6)

    # 2) bf16 input stays bf16 through the kernel (no f32 upcast of HBM traffic)
    x2 = jax.random.normal(k_x2, (2, 16, 8, 8, 8), jnp.bfloat16)
    o2 = dp_train(x2, key=k_d2)
    jax.block_until_ready(o2)
    assert o2.shape == x2.shape and o2.dtype == jnp.bfloat16
    np.testing.assert_allclose(np.asarray(o2, np.float32),
                               np.asarray(_reference(x2, p, k_d2), np.float32),
                               rtol=1e-2, atol=1e-2)

    # 3) ragged feature count exercises the pad/slice fallback path
    x3 = jax.random.normal(k_x3, (2, 3, 5, 7, 7), jnp.float32)
    o3 = dp_train(x3, key=k_d3)
    jax.block_until_ready(o3)
    np.testing.assert_allclose(np.asarray(o3), np.asarray(_reference(x3, p, k_d3)),
                               rtol=1e-6, atol=1e-6)

    # 4) p == 0 and eval mode are exact identities (no kernel launch), as in PyTorch
    assert drop_path(x1, 0.0) is x1
    assert drop_path(x1, 0.3, training=False) is x1

    print("KERNEL_OK")
</pallas_src>

<mosaic_0001>
module attributes {stable_mosaic.version = 11 : i64} {
  func.func @_drop_path_kernel(%arg0: i32, %arg1: i32, %arg2: memref<2xf32, #tpu.memory_space<smem>>, %arg3: memref<1x64x128xf32, #tpu.memory_space<vmem>>, %arg4: memref<1x64x128xf32, #tpu.memory_space<vmem>>) attributes {dimension_semantics = [#tpu.dimension_semantics<parallel>, #tpu.dimension_semantics<parallel>], iteration_bounds = array<i64: 2, 1>, scalar_prefetch = 1 : i64, scratch_operands = 0 : i64, tpu.core_type = #tpu.core_type<tc>, window_params = [{transform_indices = @transform_0, window_bounds = array<i64: 1, 64, 128>}, {transform_indices = @transform_1, window_bounds = array<i64: 1, 64, 128>}]} {
    %0 = arith.index_cast %arg0 : i32 to index
    %1 = memref.load %arg2[%0] : memref<2xf32, #tpu.memory_space<smem>>
    %c0 = arith.constant 0 : index
    %c0_0 = arith.constant 0 : index
    %c0_1 = arith.constant 0 : index
    %2 = vector.load %arg3[%c0, %c0_0, %c0_1] : memref<1x64x128xf32, #tpu.memory_space<vmem>>, vector<1x64x128xf32>
    %3 = vector.broadcast %1 : f32 to vector<1x64x128xf32>
    %4 = arith.mulf %2, %3 : vector<1x64x128xf32>
    %c0_2 = arith.constant 0 : index
    %c0_3 = arith.constant 0 : index
    %c0_4 = arith.constant 0 : index
    %5 = vector.load %arg4[%c0_2, %c0_3, %c0_4] : memref<1x64x128xf32, #tpu.memory_space<vmem>>, vector<1x64x128xf32>
    tpu.vector_store %arg4[%c0_2, %c0_3, %c0_4], %4 {strides = array<i32>} : memref<1x64x128xf32, #tpu.memory_space<vmem>>, vector<1x64x128xf32>,
    return
  }
  func.func @transform_0(%arg0: i32, %arg1: i32, %arg2: memref<2xf32, #tpu.memory_space<smem>>) -> (i32, i32, i32) {
    %c0_i32 = arith.constant 0 : i32
    %c0_i32_0 = arith.constant 0 : i32
    return %arg0, %arg1, %c0_i32 : i32, i32, i32
  }
  func.func @transform_1(%arg0: i32, %arg1: i32, %arg2: memref<2xf32, #tpu.memory_space<smem>>) -> (i32, i32, i32) {
    %c0_i32 = arith.constant 0 : i32
    %c0_i32_0 = arith.constant 0 : i32
    return %arg0, %arg1, %c0_i32 : i32, i32, i32
  }
}

</mosaic_0001>

<bundles_post_ra>
// kernel: drop_path.1
= control target key start
LH: loop header
LB: loop body
LE: loop exit
PB: predicated region body
PF: predicated region fallthrough
CT: control target
= control target key end

     0   :  { %s404_s0 = inlined_call_operand.vmem [shape: f32[2], index: 0, kind: input, shape index: {}]   ;;  %s405_s1 = inlined_call_operand.vmem [shape: f32[2,64,128], index: 1, kind: input, shape index: {}]   ;;  %s406_s2 = inlined_call_operand.vmem [shape: f32[2,64,128], index: 2, kind: output, shape index: {}]  }
   0x1   :  { %s7_s11 = sshll.u32 %s404_s0, 4  ;;  %s8_s11 = int_to_ptr.vmem [resolvable:$true] %s7_s11 }
   0x2   :  { %s314_s12 = scalar_lea.vmem %s8_s11, 16  ;;  %p319_p1 = scmp.lt.s32.totalorder %s8_s11, %s8_s11 }
   0x3   :  { %p315_p0 = scmp.ne.s32.totalorder %s8_s11, %s314_s12  ;;  %p320_p2 = scmp.lt.s32.totalorder %s314_s12, %s314_s12 }
   0x5   :  { %p321_p3 = por %p320_p2, %p319_p1 }
   0x7   :  { %p322_p4 = pnand %p321_p3, %p315_p0 }
   0x9   :  { %325 = shalt.err (!%p322_p4)  }
   0xa   :  { %s352_s13 = smov [#allocation3]  }
   0xb   :  { %10 = dma.vmem_to_smem %s8_s11, 16, %s352_s13, [#allocation2] }
   0xc   :  { %338 = dma.done.wait [#allocation2], 16 }
   0xd   :  { %339 = vsyncadd [#allocation2], 4294967280 }
   0xe   :  { %12 = sfence }
   0xf   :  { %s371_s14 = smov 0   ;;  %s373_s15 = smov 0  }
  0x10   :  { %s375_s16 = smov 0  }
  0x11 LB: > { %s30_s0 = sadd.s32 1, %s346_s15  ;;  %p280_p5 = scmp.ge.s32.totalorder %s350_s16, 1  ;;  %s350_s16 = sphi %s375_s16, %s18_s16   ;;  %s346_s15 = sphi %s373_s15, %s408_s15   ;;  %s342_s14 = sphi %s371_s14, %s407_s14  }
  0x12   : > { %p32_p6 = scmp.ge.s32.totalorder %s30_s0, 2  ;;  %p115_p7 = scmp.lt.s32.totalorder %s350_s16, 3 }
  0x14   : > { %s410_s0 = smov (%p32_p6, %s30_s0), 0  ;;  %p116_p8 = pnand %p280_p5, %p115_p7 }
  0x15   : > { %p144_p9 = scmp.lt.s32.totalorder (!%p116_p8), %s342_s14, 1  ;;  %s163_s17 = sld [smem:[#allocation3 + %s342_s14]] (!%p116_p8) }
  0x16   : > { %119 = sbr.rel (%p116_p8) target bundleno = 39 (0x27), region = 24 }
  0x1b   : > { %v172_v1 = vstv (!%p116_p8), %s163_s17 }
  0x1d   : > { %s412_s14 = smov (!%p144_p9, %s342_s14), 1 }
  0x1e   : > { %s287_s18 = sshll.u32 %s412_s14, 6 }
  0x1f   : > { %s151_s21 = scalar_lea.vmem %s405_s1, %s287_s18  ;;  %s161_s24 = scalar_lea.vmem %s406_s2, %s287_s18 }
  0x20   : > { %v164_v0 = vld [vmem:[%s151_s21] sm:$0xff]  ;;  %v165_v2 = vld [vmem:[%s151_s21 + $0x8] sm:$0xff]  ;;  %v166_v3 = vld [vmem:[%s151_s21 + $0x10] sm:$0xff] }
  0x21   : > { %v173_v4 = vmul.f32 %v172_v1, %v164_v0  ;;  %v174_v5 = vmul.f32 %v172_v1, %v165_v2  ;;  %v175_v6 = vmul.f32 %v172_v1, %v166_v3  ;;  %v167_v7 = vld [vmem:[%s151_s21 + $0x18] sm:$0xff]  ;;  %v168_v8 = vld [vmem:[%s151_s21 + $0x20] sm:$0xff]  ;;  %v169_v9 = vld [vmem:[%s151_s21 + $0x28] sm:$0xff] }
  0x22   : > { %v176_v10 = vmul.f32 %v172_v1, %v167_v7  ;;  %v177_v11 = vmul.f32 %v172_v1, %v168_v8  ;;  %v178_v12 = vmul.f32 %v172_v1, %v169_v9  ;;  %v170_v13 = vld [vmem:[%s151_s21 + $0x30] sm:$0xff]  ;;  %v171_v14 = vld [vmem:[%s151_s21 + $0x38] sm:$0xff] }
  0x23   : > { %181 = vst [vmem:[%s161_s24] sm:$0xff] %v173_v4  ;;  %182 = vst [vmem:[%s161_s24 + $0x8] sm:$0xff] %v174_v5  ;;  %v179_v15 = vmul.f32 %v172_v1, %v170_v13  ;;  %v180_v16 = vmul.f32 %v172_v1, %v171_v14 }
  0x24   : > { %183 = vst [vmem:[%s161_s24 + $0x10] sm:$0xff] %v175_v6  ;;  %184 = vst [vmem:[%s161_s24 + $0x18] sm:$0xff] %v176_v10 }
  0x25   : > { %185 = vst [vmem:[%s161_s24 + $0x20] sm:$0xff] %v177_v11  ;;  %186 = vst [vmem:[%s161_s24 + $0x28] sm:$0xff] %v178_v12 }
  0x26   : > { %187 = vst [vmem:[%s161_s24 + $0x30] sm:$0xff] %v179_v15  ;;  %188 = vst [vmem:[%s161_s24 + $0x38] sm:$0xff] %v180_v16 }
  0x27 PF: > { %s18_s16 = sadd.s32 1, %s350_s16   ;;  %s407_s14 = smov %s346_s15 }
  0x28   : > { %p15_p10 = scmp.ge.s32.totalorder %s18_s16, 4   ;;  %s408_s15 = smov %s410_s0 }
  0x2a   :  { %17 = sbr.rel (!%p15_p10) target bundleno = 17 (0x11), region = 54 }

</bundles_post_ra>
